<compile_context>
chip_gen: v7x
topology: tpu7x:2x2x1
jax: 0.10.0
libtpu: 0.0.40
codegen_flags: <defaults>
</compile_context>

<pallas_src>
import functools
import math

import jax
import jax.numpy as jnp
from jax.experimental import pallas as pl
from jax.experimental.pallas import tpu as pltpu
from jax.scipy.special import erf as erf_exact  # reference only (not used inside kernels)

LN_EPS = 1e-12
_SQRT_HALF = 0.7071067811865476


def _vmem_limit_bytes():
    # Generation-aware scoped-VMEM budget: ~3/4 of physical VMEM (96 MiB on 128-MiB
    # v5e/v6e parts, 48 MiB on 64-MiB v7x parts), conservative fallback otherwise.
    try:
        cap = int(pltpu.get_tpu_info().vmem_capacity_bytes)
        return min(3 * cap // 4, 112 * 1024 * 1024)
    except Exception:
        return 48 * 1024 * 1024


_VMEM_LIMIT = _vmem_limit_bytes()


def _cparams(dim_sem):
    # TODO(synk): on v7x, verify megacore sharding in the trace; if one TC does all the
    # work, switch the token-tile axis to pltpu.CORE_PARALLEL.
    return pltpu.CompilerParams(dimension_semantics=dim_sem,
                                vmem_limit_bytes=_VMEM_LIMIT)


def _erf(x):
    # Abramowitz & Stegun 7.1.26 polynomial (max abs err ~1.5e-7 ~= f32 eps).
    # Used instead of lax.erf because erf has no guaranteed Mosaic lowering.
    a1, a2, a3, a4, a5 = (0.254829592, -0.284496736, 1.421413741,
                          -1.453152027, 1.061405429)
    p = 0.3275911
    ax = jnp.abs(x)
    t = 1.0 / (1.0 + p * ax)
    poly = ((((a5 * t + a4) * t + a3) * t + a2) * t + a1) * t
    y = 1.0 - poly * jnp.exp(-ax * ax)
    return jnp.where(x >= 0.0, y, -y)


def _gelu(x):
    # Exact (erf-based) BERT gelu: x * 0.5 * (1 + erf(x / sqrt(2)))
    return 0.5 * x * (1.0 + _erf(x * _SQRT_HALF))


def _layernorm_rows(y, gamma, beta):
    # One-pass moments: var = E[y^2] - E[y]^2 (single pair of cross-lane reductions).
    n = y.shape[-1]
    s1 = jnp.sum(y, axis=-1, keepdims=True)
    s2 = jnp.sum(y * y, axis=-1, keepdims=True)
    mean = s1 * (1.0 / n)
    var = jnp.maximum(s2 * (1.0 / n) - mean * mean, 0.0)
    inv = jax.lax.rsqrt(var + LN_EPS)
    return (y - mean) * inv * gamma + beta


# ------------------------------- kernels -------------------------------

def _qkv_kernel(x_ref, wq_ref, wk_ref, wv_ref, bq_ref, bk_ref, bv_ref,
                q_ref, k_ref, v_ref):
    # Q/K/V kept as three separate [M, H] outputs (not one [M, 3H] buffer) so the attention
    # BlockSpecs stay legal for head-group widths < 128 and no sub-128-lane slicing is
    # needed anywhere; 1/sqrt(Dh) is already folded into wq/bq by the wrapper.
    x = x_ref[...]                      # native dtype straight into the MXU
    q = jnp.dot(x, wq_ref[...], preferred_element_type=jnp.float32)
    k = jnp.dot(x, wk_ref[...], preferred_element_type=jnp.float32)
    v = jnp.dot(x, wv_ref[...], preferred_element_type=jnp.float32)
    q_ref[...] = (q + bq_ref[...].astype(jnp.float32)).astype(q_ref.dtype)
    k_ref[...] = (k + bk_ref[...].astype(jnp.float32)).astype(k_ref.dtype)
    v_ref[...] = (v + bv_ref[...].astype(jnp.float32)).astype(v_ref.dtype)


def _attn_core_kernel(q_ref, k_ref, v_ref, mask_ref, o_ref, *, dh, hg):
    # One (batch, head-group) tile per step; blocks are (S, hg*dh) picked straight out of
    # the token-major [M, H] buffers (no head split/merge transposes in HBM).
    hgd = q_ref.shape[-1]
    q_all = q_ref[...]                  # (S, hg*dh) heads concatenated on lanes
    k_all = k_ref[...]
    v_all = v_ref[...]
    amask = mask_ref[...].astype(jnp.float32)       # (1, S) additive key mask
    if hg > 1:
        lane = jax.lax.broadcasted_iota(jnp.int32, (1, hgd), 1)

    out = None
    for h in range(hg):                 # unrolled; hg is small (1-4)
        if hg > 1:
            sel = (lane >= h * dh) & (lane < (h + 1) * dh)
            # Zeroing the other heads' Q columns makes the hgd-wide contraction exactly
            # q_h @ k_h^T. Both dh and hgd underfill the MXU contraction width, so this
            # costs the same number of MXU passes as a dh-wide matmul while keeping every
            # load/store lane-dense and avoiding sub-128-lane slicing.
            qh = jnp.where(sel, q_all, 0.0)
        else:
            qh = q_all
        scores = jax.lax.dot_general(qh, k_all, (((1,), (1,)), ((), ())),
                                     preferred_element_type=jnp.float32)
        scores = scores + amask                     # scale pre-folded into Q
        m = jnp.max(scores, axis=-1, keepdims=True)
        p = jnp.exp(scores - m)
        probs = p * pl.reciprocal(jnp.sum(p, axis=-1, keepdims=True), approx=True)
        # TODO(synk): attention-probs dropout (training mode) not emitted; eval semantics only.
        ctx = jnp.dot(probs.astype(v_all.dtype), v_all,
                      preferred_element_type=jnp.float32)   # head h's columns are valid
        out = ctx if out is None else jnp.where(sel, ctx, out)
    o_ref[...] = out.astype(o_ref.dtype)            # single dense (S, hgd) store
    # TODO(synk): for long sequences (S >~ 1k), tile over query blocks with an online
    # softmax instead of materializing the full (S, S) scores.


def _post_attn_fused_kernel(ctx_ref, res_ref, wo_ref, bo_ref, g1_ref, be1_ref,
                            wi_ref, bi_ref, w2_ref, b2_ref, g2_ref, be2_ref, o_ref):
    # BertSelfOutput + BertIntermediate + BertOutput fused: the attention output and the
    # [tm, I] intermediate never leave VMEM.
    dt = ctx_ref.dtype
    y = jnp.dot(ctx_ref[...], wo_ref[...], preferred_element_type=jnp.float32)
    y = y + bo_ref[...].astype(jnp.float32) + res_ref[...].astype(jnp.float32)
    # TODO(synk): hidden dropout (training mode) not emitted; eval semantics only.
    att = _layernorm_rows(y, g1_ref[...].astype(jnp.float32),
                          be1_ref[...].astype(jnp.float32))
    h = jnp.dot(att.astype(dt), wi_ref[...], preferred_element_type=jnp.float32)
    h = _gelu(h + bi_ref[...].astype(jnp.float32))
    z = jnp.dot(h.astype(dt), w2_ref[...], preferred_element_type=jnp.float32)
    z = z + b2_ref[...].astype(jnp.float32) + att
    o_ref[...] = _layernorm_rows(z, g2_ref[...].astype(jnp.float32),
                                 be2_ref[...].astype(jnp.float32)).astype(o_ref.dtype)


def _self_output_kernel(ctx_ref, res_ref, w_ref, b_ref, g_ref, be_ref, o_ref):
    # Split path (large weights / v7x): BertSelfOutput only.
    y = jnp.dot(ctx_ref[...], w_ref[...], preferred_element_type=jnp.float32)
    y = y + b_ref[...].astype(jnp.float32) + res_ref[...].astype(jnp.float32)
    o_ref[...] = _layernorm_rows(y, g_ref[...].astype(jnp.float32),
                                 be_ref[...].astype(jnp.float32)).astype(o_ref.dtype)


def _ffn_kernel(x_ref, w1_ref, b1_ref, w2_ref, b2_ref, g_ref, be_ref, o_ref):
    # Split path: BertIntermediate + BertOutput fused ([tm, I] intermediate stays in VMEM).
    x = x_ref[...]
    h = jnp.dot(x, w1_ref[...], preferred_element_type=jnp.float32)
    h = _gelu(h + b1_ref[...].astype(jnp.float32))
    z = jnp.dot(h.astype(x.dtype), w2_ref[...], preferred_element_type=jnp.float32)
    z = z + b2_ref[...].astype(jnp.float32) + x.astype(jnp.float32)
    o_ref[...] = _layernorm_rows(z, g_ref[...].astype(jnp.float32),
                                 be_ref[...].astype(jnp.float32)).astype(o_ref.dtype)
    # TODO(synk): for v7x at BERT-large scale, tile this FFN over the intermediate dim
    # (grid axis over I-chunks with a (tm, H) f32 accumulator) instead of splitting calls.


# ------------------------------- wrapper -------------------------------

def _head_group(num_heads, dh):
    # Smallest head group whose lane width is a multiple of 128 (e.g. 2 heads at Dh=64);
    # otherwise fall back to all heads (block == full hidden dim, always a legal BlockSpec).
    if dh % 128 == 0:
        return 1
    for hg in range(2, num_heads):
        if num_heads % hg == 0 and (hg * dh) % 128 == 0:
            return hg
    return num_heads


def bert_layer(hidden_states, attention_mask, params, *, tm=512):
    """hidden_states: [B, S, H]; attention_mask: additive mask [B, S] (0 attend / -1e4 masked)."""
    B, S, H = hidden_states.shape
    NH = params["num_heads"]
    Dh = H // NH
    M = B * S
    tm = min(tm, M)
    n_m = pl.cdiv(M, tm)
    dt = hidden_states.dtype
    I_sz = params["wi"].shape[-1]

    x2 = hidden_states.reshape(M, H)
    row = lambda i: (i, 0)        # token-tiled operand
    const2 = lambda i: (0, 0)     # weights / biases: resident across grid steps

    def vec(p):  # (N,) -> (1, N) lane vector
        return p.reshape(1, -1)

    # Fold the 1/sqrt(Dh) attention scale into the Q projection (zero kernel cost).
    scale = 1.0 / math.sqrt(Dh)
    wq = params["wq"] * scale
    bq = params["bq"] * scale

    # ---- 1) fused Q/K/V projection, tiled over tokens (token-major [M, H] outputs) ----
    q2, k2, v2 = pl.pallas_call(
        _qkv_kernel,
        out_shape=tuple(jax.ShapeDtypeStruct((M, H), dt) for _ in range(3)),
        grid_spec=pltpu.PrefetchScalarGridSpec(
            num_scalar_prefetch=0,
            grid=(n_m,),
            in_specs=[
                pl.BlockSpec((tm, H), row),
                pl.BlockSpec((H, H), const2),
                pl.BlockSpec((H, H), const2),
                pl.BlockSpec((H, H), const2),
                pl.BlockSpec((1, H), const2),
                pl.BlockSpec((1, H), const2),
                pl.BlockSpec((1, H), const2),
            ],
            out_specs=tuple(pl.BlockSpec((tm, H), row) for _ in range(3)),
        ),
        compiler_params=_cparams(("parallel",)),
    )(x2, wq, params["wk"], params["wv"], vec(bq), vec(params["bk"]), vec(params["bv"]))

    # ---- 2) attention core per (batch, head-group): no head split/merge transposes;
    #         q/k/v blocks come straight out of [M, H] and ctx is written straight back. ----
    hg = _head_group(NH, Dh)
    ng = NH // hg
    hgd = hg * Dh
    mask3 = attention_mask.reshape(B, 1, S).astype(jnp.float32)
    qkv_spec = pl.BlockSpec((S, hgd), lambda b, g: (b, g))
    ctx2 = pl.pallas_call(
        functools.partial(_attn_core_kernel, dh=Dh, hg=hg),
        out_shape=jax.ShapeDtypeStruct((M, H), dt),
        grid_spec=pltpu.PrefetchScalarGridSpec(
            num_scalar_prefetch=0,
            grid=(B, ng),
            in_specs=[qkv_spec, qkv_spec, qkv_spec,
                      pl.BlockSpec((None, 1, S), lambda b, g: (b, 0, 0))],
            out_specs=pl.BlockSpec((S, hgd), lambda b, g: (b, g)),
        ),
        compiler_params=_cparams(("parallel", "parallel")),
    )(q2, k2, v2, mask3)

    # ---- 3+4) BertSelfOutput + FFN ----
    wo, wi, w2 = params["wo"], params["wi"], params["w2"]
    weight_bytes = sum(int(w.size) * w.dtype.itemsize for w in (wo, wi, w2))
    # Default input double-buffering keeps ~2x the weights resident; fuse only when that
    # comfortably fits the scoped-VMEM budget (true on v5e/v6e at BERT-base sizes; on
    # v7x / larger models the split path below is taken).
    fuse_post = (2 * weight_bytes) < (_VMEM_LIMIT // 2)

    if fuse_post:
        out2 = pl.pallas_call(
            _post_attn_fused_kernel,
            out_shape=jax.ShapeDtypeStruct((M, H), dt),
            grid_spec=pltpu.PrefetchScalarGridSpec(
                num_scalar_prefetch=0,
                grid=(n_m,),
                in_specs=[
                    pl.BlockSpec((tm, H), row),        # ctx (attention output)
                    pl.BlockSpec((tm, H), row),        # residual (layer input)
                    pl.BlockSpec((H, H), const2),      # wo
                    pl.BlockSpec((1, H), const2),      # bo
                    pl.BlockSpec((1, H), const2),      # ln1 gamma
                    pl.BlockSpec((1, H), const2),      # ln1 beta
                    pl.BlockSpec((H, I_sz), const2),   # wi
                    pl.BlockSpec((1, I_sz), const2),   # bi
                    pl.BlockSpec((I_sz, H), const2),   # w2
                    pl.BlockSpec((1, H), const2),      # b2
                    pl.BlockSpec((1, H), const2),      # ln2 gamma
                    pl.BlockSpec((1, H), const2),      # ln2 beta
                ],
                out_specs=pl.BlockSpec((tm, H), row),
            ),
            compiler_params=_cparams(("parallel",)),
        )(ctx2, x2, wo, vec(params["bo"]), vec(params["ln1_g"]), vec(params["ln1_b"]),
          wi, vec(params["bi"]), w2, vec(params["b2"]),
          vec(params["ln2_g"]), vec(params["ln2_b"]))
    else:
        att2 = pl.pallas_call(
            _self_output_kernel,
            out_shape=jax.ShapeDtypeStruct((M, H), dt),
            grid_spec=pltpu.PrefetchScalarGridSpec(
                num_scalar_prefetch=0,
                grid=(n_m,),
                in_specs=[
                    pl.BlockSpec((tm, H), row),
                    pl.BlockSpec((tm, H), row),
                    pl.BlockSpec((H, H), const2),
                    pl.BlockSpec((1, H), const2),
                    pl.BlockSpec((1, H), const2),
                    pl.BlockSpec((1, H), const2),
                ],
                out_specs=pl.BlockSpec((tm, H), row),
            ),
            compiler_params=_cparams(("parallel",)),
        )(ctx2, x2, wo, vec(params["bo"]), vec(params["ln1_g"]), vec(params["ln1_b"]))

        out2 = pl.pallas_call(
            _ffn_kernel,
            out_shape=jax.ShapeDtypeStruct((M, H), dt),
            grid_spec=pltpu.PrefetchScalarGridSpec(
                num_scalar_prefetch=0,
                grid=(n_m,),
                in_specs=[
                    pl.BlockSpec((tm, H), row),
                    pl.BlockSpec((H, I_sz), const2),
                    pl.BlockSpec((1, I_sz), const2),
                    pl.BlockSpec((I_sz, H), const2),
                    pl.BlockSpec((1, H), const2),
                    pl.BlockSpec((1, H), const2),
                    pl.BlockSpec((1, H), const2),
                ],
                out_specs=pl.BlockSpec((tm, H), row),
            ),
            compiler_params=_cparams(("parallel",)),
        )(att2, wi, vec(params["bi"]), w2, vec(params["b2"]),
          vec(params["ln2_g"]), vec(params["ln2_b"]))

    return out2.reshape(B, S, H)


# ------------------------------- reference -------------------------------

def reference(hidden_states, attention_mask, params):
    B, S, H = hidden_states.shape
    NH = params["num_heads"]
    Dh = H // NH

    def ln(y, g, b):
        mean = jnp.mean(y, axis=-1, keepdims=True)
        var = jnp.mean((y - mean) ** 2, axis=-1, keepdims=True)
        return g * (y - mean) / jnp.sqrt(var + LN_EPS) + b

    x = hidden_states
    q = x @ params["wq"] + params["bq"]
    k = x @ params["wk"] + params["bk"]
    v = x @ params["wv"] + params["bv"]

    def split(t):
        return t.reshape(B, S, NH, Dh).transpose(0, 2, 1, 3)

    q, k, v = split(q), split(k), split(v)
    scores = jnp.einsum("bhqd,bhkd->bhqk", q, k) / math.sqrt(Dh)
    scores = scores + attention_mask[:, None, None, :]
    probs = jax.nn.softmax(scores, axis=-1)
    ctx = jnp.einsum("bhqk,bhkd->bhqd", probs, v)
    ctx = ctx.transpose(0, 2, 1, 3).reshape(B, S, H)

    att = ln(ctx @ params["wo"] + params["bo"] + x, params["ln1_g"], params["ln1_b"])
    inter = att @ params["wi"] + params["bi"]
    inter = inter * 0.5 * (1.0 + erf_exact(inter / math.sqrt(2.0)))
    out = ln(inter @ params["w2"] + params["b2"] + att, params["ln2_g"], params["ln2_b"])
    return out


if __name__ == "__main__":
    B, S, H, NH, I_sz = 2, 8, 32, 4, 64
    f32 = jnp.float32
    keys = jax.random.split(jax.random.PRNGKey(0), 18)

    x = jax.random.normal(keys[0], (B, S, H), dtype=f32)
    # additive attention mask (0 = attend, -10000 = masked); mask the last 2 keys of batch 1
    attention_mask = jnp.zeros((B, S), dtype=f32).at[1, 6:].set(-10000.0)

    def lin_w(k, fan_in, shape):
        return jax.random.normal(k, shape, dtype=f32) * (1.0 / math.sqrt(fan_in))

    params = {
        "num_heads": NH,
        "wq": lin_w(keys[1], H, (H, H)),  "bq": 0.02 * jax.random.normal(keys[2], (H,), f32),
        "wk": lin_w(keys[3], H, (H, H)),  "bk": 0.02 * jax.random.normal(keys[4], (H,), f32),
        "wv": lin_w(keys[5], H, (H, H)),  "bv": 0.02 * jax.random.normal(keys[6], (H,), f32),
        "wo": lin_w(keys[7], H, (H, H)),  "bo": 0.02 * jax.random.normal(keys[8], (H,), f32),
        "ln1_g": 1.0 + 0.05 * jax.random.normal(keys[9], (H,), f32),
        "ln1_b": 0.05 * jax.random.normal(keys[10], (H,), f32),
        "wi": lin_w(keys[11], H, (H, I_sz)),
        "bi": 0.02 * jax.random.normal(keys[12], (I_sz,), f32),
        "w2": lin_w(keys[13], I_sz, (I_sz, H)),
        "b2": 0.02 * jax.random.normal(keys[14], (H,), f32),
        "ln2_g": 1.0 + 0.05 * jax.random.normal(keys[15], (H,), f32),
        "ln2_b": 0.05 * jax.random.normal(keys[16], (H,), f32),
    }

    out = bert_layer(x, attention_mask, params)
    out = jax.block_until_ready(out)

    ref = reference(x, attention_mask, params)
    assert out.shape == (B, S, H)
    err = jnp.max(jnp.abs(out - ref))
    # tolerance 2e-3: the approx (EUP) reciprocal in the softmax and the erf polynomial add
    # ~1e-4-scale error relative to the exact-division / exact-erf f32 reference.
    assert jnp.allclose(out, ref, atol=2e-3, rtol=2e-3), f"mismatch vs reference (max abs err {err})"

    print("KERNEL_OK")
</pallas_src>

<mosaic_0001>
module attributes {stable_mosaic.version = 11 : i64} {
  func.func @_qkv_kernel(%arg0: i32, %arg1: memref<16x32xf32, #tpu.memory_space<vmem>>, %arg2: memref<32x32xf32, #tpu.memory_space<vmem>>, %arg3: memref<32x32xf32, #tpu.memory_space<vmem>>, %arg4: memref<32x32xf32, #tpu.memory_space<vmem>>, %arg5: memref<1x32xf32, #tpu.memory_space<vmem>>, %arg6: memref<1x32xf32, #tpu.memory_space<vmem>>, %arg7: memref<1x32xf32, #tpu.memory_space<vmem>>, %arg8: memref<16x32xf32, #tpu.memory_space<vmem>>, %arg9: memref<16x32xf32, #tpu.memory_space<vmem>>, %arg10: memref<16x32xf32, #tpu.memory_space<vmem>>) attributes {dimension_semantics = [#tpu.dimension_semantics<parallel>], iteration_bounds = array<i64: 1>, scalar_prefetch = 0 : i64, scratch_operands = 0 : i64, tpu.core_type = #tpu.core_type<tc>, window_params = [{transform_indices = @transform_0, window_bounds = array<i64: 16, 32>}, {pipeline_mode = #tpu.pipeline_mode<synchronous>, transform_indices = @transform_1, window_bounds = array<i64: 32, 32>}, {pipeline_mode = #tpu.pipeline_mode<synchronous>, transform_indices = @transform_2, window_bounds = array<i64: 32, 32>}, {pipeline_mode = #tpu.pipeline_mode<synchronous>, transform_indices = @transform_3, window_bounds = array<i64: 32, 32>}, {pipeline_mode = #tpu.pipeline_mode<synchronous>, transform_indices = @transform_4, window_bounds = array<i64: 1, 32>}, {pipeline_mode = #tpu.pipeline_mode<synchronous>, transform_indices = @transform_5, window_bounds = array<i64: 1, 32>}, {pipeline_mode = #tpu.pipeline_mode<synchronous>, transform_indices = @transform_6, window_bounds = array<i64: 1, 32>}, {transform_indices = @transform_7, window_bounds = array<i64: 16, 32>}, {transform_indices = @transform_8, window_bounds = array<i64: 16, 32>}, {transform_indices = @transform_9, window_bounds = array<i64: 16, 32>}]} {
    %c0 = arith.constant 0 : index
    %c0_0 = arith.constant 0 : index
    %0 = vector.load %arg1[%c0, %c0_0] : memref<16x32xf32, #tpu.memory_space<vmem>>, vector<16x32xf32>
    %c0_1 = arith.constant 0 : index
    %c0_2 = arith.constant 0 : index
    %1 = vector.load %arg2[%c0_1, %c0_2] : memref<32x32xf32, #tpu.memory_space<vmem>>, vector<32x32xf32>
    %cst = arith.constant dense<0.000000e+00> : vector<16x32xf32>
    %2 = tpu.matmul %0, %1, %cst {dimension_numbers = #tpu.dot_dimension_numbers<[1], [0], [0], [1], [0, 0, 1, 1], [], []>} : vector<16x32xf32>, vector<32x32xf32>, vector<16x32xf32> -> vector<16x32xf32>
    %c0_3 = arith.constant 0 : index
    %c0_4 = arith.constant 0 : index
    %3 = vector.load %arg3[%c0_3, %c0_4] : memref<32x32xf32, #tpu.memory_space<vmem>>, vector<32x32xf32>
    %cst_5 = arith.constant dense<0.000000e+00> : vector<16x32xf32>
    %4 = tpu.matmul %0, %3, %cst_5 {dimension_numbers = #tpu.dot_dimension_numbers<[1], [0], [0], [1], [0, 0, 1, 1], [], []>} : vector<16x32xf32>, vector<32x32xf32>, vector<16x32xf32> -> vector<16x32xf32>
    %c0_6 = arith.constant 0 : index
    %c0_7 = arith.constant 0 : index
    %5 = vector.load %arg4[%c0_6, %c0_7] : memref<32x32xf32, #tpu.memory_space<vmem>>, vector<32x32xf32>
    %cst_8 = arith.constant dense<0.000000e+00> : vector<16x32xf32>
    %6 = tpu.matmul %0, %5, %cst_8 {dimension_numbers = #tpu.dot_dimension_numbers<[1], [0], [0], [1], [0, 0, 1, 1], [], []>} : vector<16x32xf32>, vector<32x32xf32>, vector<16x32xf32> -> vector<16x32xf32>
    %c0_9 = arith.constant 0 : index
    %c0_10 = arith.constant 0 : index
    %7 = vector.load %arg5[%c0_9, %c0_10] : memref<1x32xf32, #tpu.memory_space<vmem>>, vector<1x32xf32>
    %8 = vector.broadcast %7 : vector<1x32xf32> to vector<16x32xf32>
    %9 = arith.addf %2, %8 : vector<16x32xf32>
    %c0_11 = arith.constant 0 : index
    %c0_12 = arith.constant 0 : index
    %10 = vector.load %arg8[%c0_11, %c0_12] : memref<16x32xf32, #tpu.memory_space<vmem>>, vector<16x32xf32>
    tpu.vector_store %arg8[%c0_11, %c0_12], %9 {strides = array<i32>} : memref<16x32xf32, #tpu.memory_space<vmem>>, vector<16x32xf32>,
    %c0_13 = arith.constant 0 : index
    %c0_14 = arith.constant 0 : index
    %11 = vector.load %arg6[%c0_13, %c0_14] : memref<1x32xf32, #tpu.memory_space<vmem>>, vector<1x32xf32>
    %12 = vector.broadcast %11 : vector<1x32xf32> to vector<16x32xf32>
    %13 = arith.addf %4, %12 : vector<16x32xf32>
    %c0_15 = arith.constant 0 : index
    %c0_16 = arith.constant 0 : index
    %14 = vector.load %arg9[%c0_15, %c0_16] : memref<16x32xf32, #tpu.memory_space<vmem>>, vector<16x32xf32>
    tpu.vector_store %arg9[%c0_15, %c0_16], %13 {strides = array<i32>} : memref<16x32xf32, #tpu.memory_space<vmem>>, vector<16x32xf32>,
    %c0_17 = arith.constant 0 : index
    %c0_18 = arith.constant 0 : index
    %15 = vector.load %arg7[%c0_17, %c0_18] : memref<1x32xf32, #tpu.memory_space<vmem>>, vector<1x32xf32>
    %16 = vector.broadcast %15 : vector<1x32xf32> to vector<16x32xf32>
    %17 = arith.addf %6, %16 : vector<16x32xf32>
    %c0_19 = arith.constant 0 : index
    %c0_20 = arith.constant 0 : index
    %18 = vector.load %arg10[%c0_19, %c0_20] : memref<16x32xf32, #tpu.memory_space<vmem>>, vector<16x32xf32>
    tpu.vector_store %arg10[%c0_19, %c0_20], %17 {strides = array<i32>} : memref<16x32xf32, #tpu.memory_space<vmem>>, vector<16x32xf32>,
    return
  }
  func.func @transform_0(%arg0: i32) -> (i32, i32) {
    %c0_i32 = arith.constant 0 : i32
    %c0_i32_0 = arith.constant 0 : i32
    return %arg0, %c0_i32 : i32, i32
  }
  func.func @transform_1(%arg0: i32) -> (i32, i32) {
    %c0_i32 = arith.constant 0 : i32
    %c0_i32_0 = arith.constant 0 : i32
    %c0_i32_1 = arith.constant 0 : i32
    return %c0_i32, %c0_i32_0 : i32, i32
  }
  func.func @transform_2(%arg0: i32) -> (i32, i32) {
    %c0_i32 = arith.constant 0 : i32
    %c0_i32_0 = arith.constant 0 : i32
    %c0_i32_1 = arith.constant 0 : i32
    return %c0_i32, %c0_i32_0 : i32, i32
  }
  func.func @transform_3(%arg0: i32) -> (i32, i32) {
    %c0_i32 = arith.constant 0 : i32
    %c0_i32_0 = arith.constant 0 : i32
    %c0_i32_1 = arith.constant 0 : i32
    return %c0_i32, %c0_i32_0 : i32, i32
  }
  func.func @transform_4(%arg0: i32) -> (i32, i32) {
    %c0_i32 = arith.constant 0 : i32
    %c0_i32_0 = arith.constant 0 : i32
    %c0_i32_1 = arith.constant 0 : i32
    return %c0_i32, %c0_i32_0 : i32, i32
  }
  func.func @transform_5(%arg0: i32) -> (i32, i32) {
    %c0_i32 = arith.constant 0 : i32
    %c0_i32_0 = arith.constant 0 : i32
    %c0_i32_1 = arith.constant 0 : i32
    return %c0_i32, %c0_i32_0 : i32, i32
  }
  func.func @transform_6(%arg0: i32) -> (i32, i32) {
    %c0_i32 = arith.constant 0 : i32
    %c0_i32_0 = arith.constant 0 : i32
    %c0_i32_1 = arith.constant 0 : i32
    return %c0_i32, %c0_i32_0 : i32, i32
  }
  func.func @transform_7(%arg0: i32) -> (i32, i32) {
    %c0_i32 = arith.constant 0 : i32
    %c0_i32_0 = arith.constant 0 : i32
    return %arg0, %c0_i32 : i32, i32
  }
  func.func @transform_8(%arg0: i32) -> (i32, i32) {
    %c0_i32 = arith.constant 0 : i32
    %c0_i32_0 = arith.constant 0 : i32
    return %arg0, %c0_i32 : i32, i32
  }
  func.func @transform_9(%arg0: i32) -> (i32, i32) {
    %c0_i32 = arith.constant 0 : i32
    %c0_i32_0 = arith.constant 0 : i32
    return %arg0, %c0_i32 : i32, i32
  }
}

</mosaic_0001>

<bundles_post_ra>
// kernel: tpu_custom_call.1
= control target key start
LH: loop header
LB: loop body
LE: loop exit
PB: predicated region body
PF: predicated region fallthrough
CT: control target
= control target key end

     0   :  { %15 = vsyncpa [#allocation3], 0  ;;  %s872_s0 = inlined_call_operand.hbm [shape: f32[16,32], index: 0, kind: input, shape index: {}]   ;;  %s873_s1 = inlined_call_operand.hbm [shape: f32[32,32], index: 1, kind: input, shape index: {}]   ;;  %s874_s2 = inlined_call_operand.hbm [shape: f32[32,32], index: 2, kind: input, shape index: {}]   ;;  %s875_s3 = inlined_call_operand.hbm [shape: f32[32,32], index: 3, kind: input, shape index: {}]   ;;  %s876_s4 = inlined_call_operand.vmem [shape: f32[1,32], index: 4, kind: input, shape index: {}]   ;;  %s877_s5 = inlined_call_operand.vmem [shape: f32[1,32], index: 5, kind: input, shape index: {}]   ;;  %s878_s6 = inlined_call_operand.vmem [shape: f32[1,32], index: 6, kind: input, shape index: {}]   ;;  %s879_s7 = inlined_call_operand.hbm [shape: f32[16,32], index: 7, kind: output, shape index: {0}]   ;;  %s880_s8 = inlined_call_operand.hbm [shape: f32[16,32], index: 8, kind: output, shape index: {1}]   ;;  %s881_s9 = inlined_call_operand.hbm [shape: f32[16,32], index: 9, kind: output, shape index: {2}]  }
   0x1   :  { %16 = vsyncpa [#allocation6], 0 }
   0x2   :  { %17 = vsyncpa [#allocation9], 0 }
   0x3   :  { %18 = vsyncpa [#allocation4], 0 }
   0x4   :  { %19 = vsyncpa [#allocation12], 0  ;;  %s666_s30 = smov [#allocation5]   ;;  %s667_s11 = smov [#allocation2]  }
   0x5   :  { %s37_s10 = sshll.u32 %s666_s30, 4  ;;  %s25_s12 = sshll.u32 %s667_s11, 4  ;;  %s38_s10 = int_to_ptr.vmem [resolvable:$true] %s37_s10  ;;  %s725_s12 = int_to_ptr.vmem [resolvable:$true] %s25_s12 }
   0x6   :  { %s502_s15 = scalar_lea.hbm %s873_s1, 512 }
   0x7   :  { %p503_p0 = scmp.ne.s32.totalorder %s873_s1, %s502_s15  ;;  %p506_p1 = scmp.lt.u32.totalorder %s502_s15, %s873_s1 }
   0x9   :  { %p508_p2 = pnand %p506_p1, %p503_p0 }
   0xb   :  { %511 = shalt.err (!%p508_p2)
}
   0xc   :  { %s512_s20 = scalar_lea.vmem %s38_s10, 512  ;;  %p517_p4 = scmp.lt.s32.totalorder %s38_s10, %s38_s10 }
   0xd   :  { %p513_p3 = scmp.ne.s32.totalorder %s38_s10, %s512_s20  ;;  %p518_p5 = scmp.lt.s32.totalorder %s512_s20, %s512_s20 }
   0xf   :  { %p519_p6 = por %p518_p5, %p517_p4 }
  0x11   :  { %p520_p7 = pnand %p519_p6, %p513_p3 }
  0x13   :  { %523 = shalt.err (!%p520_p7)
}
  0x14   :  { %s668_s21 = smov 128   ;;  %s669_s22 = smov 8  }
  0x15   :  { %43 = dma.hbm_to_vmem [thread:$0]  %s873_s1, 512, %s38_s10, [#allocation6], %s668_s21, %s668_s21, %s669_s22  }
  0x16   :  { %s524_s27 = scalar_lea.hbm %s872_s0, 256 }
  0x17   :  { %p525_p8 = scmp.ne.s32.totalorder %s872_s0, %s524_s27  ;;  %p528_p9 = scmp.lt.u32.totalorder %s524_s27, %s872_s0 }
  0x19   :  { %p530_p10 = pnand %p528_p9, %p525_p8 }
  0x1b   :  { %533 = shalt.err (!%p530_p10)
}
  0x1c   :  { %s534_s13 = scalar_lea.vmem %s725_s12, 256  ;;  %p539_p12 = scmp.lt.s32.totalorder %s725_s12, %s725_s12 }
  0x1d   :  { %p535_p11 = scmp.ne.s32.totalorder %s725_s12, %s534_s13  ;;  %p540_p13 = scmp.lt.s32.totalorder %s534_s13, %s534_s13 }
  0x1f   :  { %p541_p0 = por %p540_p13, %p539_p12 }
  0x21   :  { %p542_p1 = pnand %p541_p0, %p535_p11 }
  0x23   :  { %545 = shalt.err (!%p542_p1)
}
  0x24   :  { %31 = dma.hbm_to_vmem [thread:$0]  %s872_s0, 256, %s725_s12, [#allocation3], %s668_s21, %s668_s21, %s669_s22  }
  0x25   :  { %s670_s14 = smov [#allocation7]   ;;  %s671_s16 = smov [#allocation8]  }
  0x26   :  { %s49_s15 = sshll.u32 %s670_s14, 4  ;;  %s61_s17 = sshll.u32 %s671_s16, 4  ;;  %s50_s15 = int_to_ptr.vmem [resolvable:$true] %s49_s15  ;;  %s762_s17 = int_to_ptr.vmem [resolvable:$true] %s61_s17 }
  0x27   :  { %s546_s20 = scalar_lea.hbm %s874_s2, 512 }
  0x28   :  { %p547_p2 = scmp.ne.s32.totalorder %s874_s2, %s546_s20  ;;  %p550_p3 = scmp.lt.u32.totalorder %s546_s20, %s874_s2 }
  0x2a   :  { %p552_p4 = pnand %p550_p3, %p547_p2 }
  0x2c   :  { %555 = shalt.err (!%p552_p4)
}
  0x2d   :  { %s556_s0 = scalar_lea.vmem %s50_s15, 512  ;;  %p561_p6 = scmp.lt.s32.totalorder %s50_s15, %s50_s15 }
  0x2e   :  { %p557_p5 = scmp.ne.s32.totalorder %s50_s15, %s556_s0  ;;  %p562_p7 = scmp.lt.s32.totalorder %s556_s0, %s556_s0 }
  0x30   :  { %p563_p8 = por %p562_p7, %p561_p6 }
  0x32   :  { %p564_p9 = pnand %p563_p8, %p557_p5 }
  0x34   :  { %567 = shalt.err (!%p564_p9)
}
  0x35   :  { %55 = dma.hbm_to_vmem [thread:$0]  %s874_s2, 512, %s50_s15, [#allocation6], %s668_s21, %s668_s21, %s669_s22  }
  0x36   :  { %s568_s30 = scalar_lea.hbm %s875_s3, 512 }
  0x37   :  { %p569_p10 = scmp.ne.s32.totalorder %s875_s3, %s568_s30  ;;  %p572_p11 = scmp.lt.u32.totalorder %s568_s30, %s875_s3 }
  0x39   :  { %p574_p12 = pnand %p572_p11, %p569_p10 }
  0x3b   :  { %577 = shalt.err (!%p574_p12)
}
  0x3c   :  { %s578_s14 = scalar_lea.vmem %s762_s17, 512  ;;  %p583_p0 = scmp.lt.s32.totalorder %s762_s17, %s762_s17 }
  0x3d   :  { %p579_p13 = scmp.ne.s32.totalorder %s762_s17, %s578_s14  ;;  %p584_p1 = scmp.lt.s32.totalorder %s578_s14, %s578_s14 }
  0x3f   :  { %p585_p2 = por %p584_p1, %p583_p0 }
  0x41   :  { %p586_p3 = pnand %p585_p2, %p579_p13 }
  0x43   :  { %589 = shalt.err (!%p586_p3)
}
  0x44   :  { %67 = dma.hbm_to_vmem [thread:$0]  %s875_s3, 512, %s762_s17, [#allocation9], %s668_s21, %s668_s21, %s669_s22  }
  0x45   :  { %656 = dma.done.wait [#allocation3], 256  }
  0x46   :  { %657 = vsyncadd [#allocation3], 4294967040 }
  0x47   :  { %658 = dma.done.wait [#allocation6], 1024  }
  0x48   :  { %659 = vsyncadd [#allocation6], 4294966272 }
  0x49   :  { %660 = dma.done.wait [#allocation9], 512  }
  0x4a   :  { %661 = vsyncadd [#allocation9], 4294966784  ;;  %v88_v0 = vld [vmem:[#allocation5] sm:$0xff]  ;;  %v89_v1 = vld [vmem:[#allocation5 + $0x8] sm:$0xff]  ;;  %vm107_vm0 = vcmask 261120   ;;  %s672_s19 = smov [#allocation10]  }
  0x4b   :  { %v90_v2 = vld [vmem:[#allocation5 + $0x10] sm:$0xff]  ;;  %v469_v3 = vpack.c.bf16 %v89_v1, %v88_v0  ;;  %v91_v4 = vld [vmem:[#allocation5 + $0x18] sm:$0xff]  ;;  %v92_v5 = vld [vmem:[#allocation7] sm:$0xff]  ;;  %s364_s20 = sshll.u32 %s672_s19, 4  ;;  %s673_s23 = smov [#allocation11]   ;;  %s365_s20 = int_to_ptr.vmem [resolvable:$true] %s364_s20 }
  0x4c   :  { %v93_v6 = vld [vmem:[#allocation7 + $0x8] sm:$0xff]  ;;  %v473_v7 = vpack.c.bf16 %v91_v4, %v90_v2  ;;  %v86_v9 = vld [vmem:[#allocation2] sm:$0xff]  ;;  %v96_v10 = vld [vmem:[#allocation8] sm:$0xff]  ;;  %s376_s24 = sshll.u32 %s673_s23, 4  ;;  %s590_s25 = scalar_lea.vmem %s365_s20, 256  ;;  %s812_s24 = int_to_ptr.vmem [resolvable:$true] %s376_s24 }
  0x4d   :  { %v477_v8 = vpack.c.bf16 %v93_v6, %v92_v5  ;;  %470 = vmatprep.subr.bf16.mxu0 %v469_v3  ;;  %444 = vmatprep.mubr.msk.f32.mxu0 %vm107_vm0, %v86_v9  ;;  %v97_v11 = vld [vmem:[#allocation8 + $0x8] sm:$0xff]  ;;  %v94_v12 = vld [vmem:[#allocation7 + $0x10] sm:$0xff]  ;;  %v95_v13 = vld [vmem:[#allocation7 + $0x18] sm:$0xff]  ;;  %p591_p4 = scmp.ne.s32.totalorder %s365_s20, %s590_s25  ;;  %p595_p5 = scmp.lt.s32.totalorder %s365_s20, %s365_s20 }
  0x4e   :  { %472 = vmatpush3.bf16.msra.mxu0 %v469_v3  ;;  %v481_v14 = vpack.c.bf16 %v95_v13, %v94_v12  ;;  %v485_v15 = vpack.c.bf16 %v97_v11, %v96_v10  ;;  %v98_v16 = vld [vmem:[#allocation8 + $0x10] sm:$0xff]  ;;  %v99_v17 = vld [vmem:[#allocation8 + $0x18] sm:$0xff]  ;;  %455 = vmatprep.mubr.msk.f32.mxu1 %vm107_vm0, %v86_v9  ;;  %p596_p6 = scmp.lt.s32.totalorder %s590_s25, %s590_s25 }
  0x4f   :  { %478 = vmatprep.subr.bf16.mxu1 %v477_v8  ;;  %474 = vmatprep.subr.bf16.mxu0 %v473_v7  ;;  %v87_v18 = vld [vmem:[#allocation2 + $0x8] sm:$0xff]  ;;  %v489_v19 = vpack.c.bf16 %v99_v17, %v98_v16  ;;  %v409_v20 = vld [vmem:[%s876_s4] ss:$0 sm:$0xff] }
  0x50   :  { %480 = vmatpush3.bf16.msra.mxu1 %v477_v8  ;;  %v412_v21 = vld [vmem:[%s877_s5] ss:$0 sm:$0xff]  ;;  %p597_p7 = por %p596_p6, %p595_p5 }
  0x51   :  { %482 = vmatprep.subr.bf16.mxu1 %v481_v14  ;;  %v415_v30 = vld [vmem:[%s878_s6] ss:$0 sm:$0xff] }
  0x52   :  { %476 = vmatpush3.bf16.msra.mxu0 %v473_v7  ;;  %p598_p8 = pnand %p597_p7, %p591_p4 }
  0x53   :  { %486 = vmatprep.subr.bf16.mxu0 %v485_v15 }
  0x54   :  { %484 = vmatpush3.bf16.msra.mxu1 %v481_v14 }
  0x55   :  { %445 = vmatmul.mubr.msk.f32.vlgmr.msra.gmra.mrb[0].mxu0 %vm107_vm0, %v87_v18 }
  0x56   :  { %488 = vmatpush3.bf16.msra.mxu0 %v485_v15  ;;  %466 = vmatprep.mubr.msk.f32.mxu0 %vm107_vm0, %v86_v9 }
  0x57   :  { %456 = vmatmul.mubr.msk.f32.vlgmr.msra.gmra.mrb[0].mxu1 %vm107_vm0, %v87_v18  ;;  %490 = vmatprep.subr.bf16.mxu0 %v489_v19 }
  0x5a   :  { %492 = vmatpush3.bf16.msra.mxu0 %v489_v19 }
  0x5d   :  { %467 = vmatmul.mubr.msk.f32.vlgmr.msra.gmra.mrb[2].mxu0 %vm107_vm0, %v87_v18 }
 0x128   :  { %v446_v22 = vpop.f32.mrb[0].mxu0 }
 0x129   :  { %v186_v23 = vadd.f32 %v446_v22, %v409_v20  ;;  %v180_v24 = vpop.f32.mrb[1].mxu0 }
 0x12a   :  { %v457_v25 = vpop.f32.mrb[0].mxu1  ;;  %v181_v26 = vadd.f32 %v409_v20, %v180_v24 }
 0x12b   :  { %v270_v27 = vadd.f32 %v457_v25, %v412_v21  ;;  %v264_v28 = vpop.f32.mrb[1].mxu1  ;;  %190 = vst.msk [vmem:[#allocation10 + $0x8] sm:$0xff] %vm107_vm0, %v186_v23 }
 0x12c   :  { %v265_v29 = vadd.f32 %v412_v21, %v264_v28  ;;  %189 = vst.msk [vmem:[#allocation10] sm:$0xff] %vm107_vm0, %v181_v26 }
 0x12d   :  { %274 = vst.msk [vmem:[#allocation11 + $0x8] sm:$0xff] %vm107_vm0, %v270_v27 }
 0x12e   :  { %273 = vst.msk [vmem:[#allocation11] sm:$0xff] %vm107_vm0, %v265_v29 }
 0x12f   :  { %601 = shalt.err (!%p598_p8)
}
 0x130   :  { %s602_s12 = scalar_lea.hbm %s879_s7, 256 }
 0x131   :  { %p603_p9 = scmp.ne.s32.totalorder %s879_s7, %s602_s12  ;;  %p606_p10 = scmp.lt.u32.totalorder %s602_s12, %s879_s7 }
 0x133   :  { %p608_p11 = pnand %p606_p10, %p603_p9 }
 0x135   :  { %611 = shalt.err (!%p608_p11)
}
 0x136   :  { %370 = dma.vmem_to_hbm [thread:$0]  %s365_s20, 256, %s879_s7, [#allocation4], %s668_s21, %s668_s21, %s669_s22  }
 0x137   :  { %s612_s13 = scalar_lea.vmem %s812_s24, 256  ;;  %p617_p13 = scmp.lt.s32.totalorder %s812_s24, %s812_s24 }
 0x138   :  { %p613_p12 = scmp.ne.s32.totalorder %s812_s24, %s612_s13  ;;  %p618_p0 = scmp.lt.s32.totalorder %s612_s13, %s612_s13 }
 0x13a   :  { %p619_p1 = por %p618_p0, %p617_p13 }
 0x13c   :  { %p620_p2 = pnand %p619_p1, %p613_p12 }
 0x13e   :  { %623 = shalt.err (!%p620_p2)
}
 0x13f   :  { %s624_s14 = scalar_lea.hbm %s880_s8, 256 }
 0x140   :  { %p625_p3 = scmp.ne.s32.totalorder %s880_s8, %s624_s14  ;;  %p628_p4 = scmp.lt.u32.totalorder %s624_s14, %s880_s8 }
 0x142   :  { %p630_p5 = pnand %p628_p4, %p625_p3 }
 0x144   :  { %633 = shalt.err (!%p630_p5)
}
 0x145   :  { %382 = dma.vmem_to_hbm [thread:$0]  %s812_s24, 256, %s880_s8, [#allocation12], %s668_s21, %s668_s21, %s669_s22   ;;  %v468_v31 = vpop.f32.mrb[2].mxu0 }
 0x146   :  { %s674_s18 = smov [#allocation13]   ;;  %v354_v32 = vadd.f32 %v468_v31, %v415_v30  ;;  %v348_v33 = vpop.f32.mrb[3].mxu0 }
 0x147   :  { %s388_s19 = sshll.u32 %s674_s18, 4  ;;  %v349_v34 = vadd.f32 %v415_v30, %v348_v33  ;;  %s389_s19 = int_to_ptr.vmem [resolvable:$true] %s388_s19 }
 0x148   :  { %358 = vst.msk [vmem:[#allocation13 + $0x8] sm:$0xff] %vm107_vm0, %v354_v32  ;;  %s634_s20 = scalar_lea.vmem %s389_s19, 256  ;;  %p639_p7 = scmp.lt.s32.totalorder %s389_s19, %s389_s19 }
 0x149   :  { %357 = vst.msk [vmem:[#allocation13] sm:$0xff] %vm107_vm0, %v349_v34  ;;  %p635_p6 = scmp.ne.s32.totalorder %s389_s19, %s634_s20  ;;  %p640_p8 = scmp.lt.s32.totalorder %s634_s20, %s634_s20 }
 0x14b   :  { %p641_p9 = por %p640_p8, %p639_p7 }
 0x14d   :  { %p642_p10 = pnand %p641_p9, %p635_p6 }
 0x14f   :  { %645 = shalt.err (!%p642_p10)
}
 0x150   :  { %s646_s24 = scalar_lea.hbm %s881_s9, 256 }
 0x151   :  { %p647_p11 = scmp.ne.s32.totalorder %s881_s9, %s646_s24  ;;  %p650_p12 = scmp.lt.u32.totalorder %s646_s24, %s881_s9 }
 0x153   :  { %p652_p13 = pnand %p650_p12, %p647_p11 }
 0x155   :  { %655 = shalt.err (!%p652_p13)
}
 0x156   :  { %394 = dma.vmem_to_hbm [thread:$0]  %s389_s19, 256, %s881_s9, [#allocation12], %s668_s21, %s668_s21, %s669_s22  }
 0x157   :  { %662 = dma.done.wait [#allocation4], 256  }
 0x158   :  { %663 = vsyncadd [#allocation4], 4294967040 }
 0x159   :  { %664 = dma.done.wait [#allocation12], 512  }
 0x15a   :  { %665 = vsyncadd [#allocation12], 4294966784 }
 0x15b   :  { %404 = vsyncpa [#allocation3], 1 }
 0x15c   :  { %405 = vsyncpa [#allocation6], 1 }
 0x15d   :  { %406 = vsyncpa [#allocation9], 1 }
 0x15e   :  { %407 = vsyncpa [#allocation4], 1 }
 0x15f   :  { %408 = vsyncpa [#allocation12], 1 }

</bundles_post_ra>
